<compile_context>
chip_gen: v6e
topology: v6e:2x2x1
jax: 0.10.0
libtpu: 0.0.40
codegen_flags: <defaults>
</compile_context>

<pallas_src>
import functools

import jax
import jax.numpy as jnp
from jax.experimental import pallas as pl
from jax.experimental.pallas import tpu as pltpu


def _round_up(x, m):
    return (x + m - 1) // m * m


def _sigmoid(x):
    # 1/(1+exp(-x)); approx reciprocal executes on the EUP slot, not the VALU.
    return pl.reciprocal(1.0 + jnp.exp(-x), approx=True)


# ----------------------------------------------------------------------------
# Kernel
# ----------------------------------------------------------------------------
def rnn_agent_kernel(x_ref, h_ref, w1_ref, b1_ref, wg_ref, bg_ref,
                     w2_ref, b2_ref, q_ref, hout_ref):
    Hp = hout_ref.shape[-1]

    h_f32 = h_ref[...]                       # hidden state carried in f32
    h_bf16 = h_f32.astype(jnp.bfloat16)

    # fc1 + ReLU  (bf16 feeds the MXU, f32 accumulation / epilogue).
    x1 = jnp.dot(x_ref[...].astype(jnp.bfloat16), w1_ref[...],
                 preferred_element_type=jnp.float32) + b1_ref[...]
    x1 = jnp.maximum(x1, 0.0)

    # Fused GRU gate matmul producing lane blocks [r | z | i_n | h_n].
    # Two accumulated MXU calls on static ref views (no concat buffer).
    g = jnp.dot(x1.astype(jnp.bfloat16), wg_ref[0:Hp, :],
                preferred_element_type=jnp.float32)
    g = g + jnp.dot(h_bf16, wg_ref[Hp:2 * Hp, :],
                    preferred_element_type=jnp.float32)
    g = g + bg_ref[...]

    r = _sigmoid(g[:, 0:Hp])
    z = _sigmoid(g[:, Hp:2 * Hp])
    n = jnp.tanh(g[:, 2 * Hp:3 * Hp] + r * g[:, 3 * Hp:4 * Hp])
    h_new = n + z * (h_f32 - n)              # == (1 - z) * n + z * h

    # fc2
    q = jnp.dot(h_new.astype(jnp.bfloat16), w2_ref[...],
                preferred_element_type=jnp.float32) + b2_ref[...]

    q_ref[...] = q.astype(q_ref.dtype)
    hout_ref[...] = h_new.astype(hout_ref.dtype)


# ----------------------------------------------------------------------------
# Parameters
# ----------------------------------------------------------------------------
def init_params(key, input_dim, hidden_dim, n_actions):
    """Deterministic init; weights stored transposed for (in, out) matmuls."""
    ks = jax.random.split(key, 10)
    u = lambda k, shape, fan_in: jax.random.uniform(
        k, shape, jnp.float32, -1.0 / jnp.sqrt(fan_in), 1.0 / jnp.sqrt(fan_in))
    return {
        # fc1: Linear(input_dim, H) -> stored as (E, H)
        "w1": u(ks[0], (input_dim, hidden_dim), input_dim),
        "b1": u(ks[1], (hidden_dim,), input_dim),
        # GRUCell(H, H): gate order [r | z | n], stored as (H, 3H)
        "w_ih": u(ks[2], (hidden_dim, 3 * hidden_dim), hidden_dim),
        "b_ih": u(ks[3], (3 * hidden_dim,), hidden_dim),
        "w_hh": u(ks[4], (hidden_dim, 3 * hidden_dim), hidden_dim),
        "b_hh": u(ks[5], (3 * hidden_dim,), hidden_dim),
        # fc2: Linear(H, n_actions) -> stored as (H, A)
        "w2": u(ks[6], (hidden_dim, n_actions), hidden_dim),
        "b2": u(ks[7], (n_actions,), hidden_dim),
    }


def prepare_weights(params):
    """Pack / pad / cast logical params into the kernel layout (run once)."""
    E, H = params["w1"].shape
    A = params["w2"].shape[1]
    Hp = _round_up(H, 128)
    Ap = _round_up(A, 128)

    w1 = jnp.zeros((E, Hp), jnp.float32).at[:, :H].set(params["w1"])
    b1 = jnp.zeros((1, Hp), jnp.float32).at[0, :H].set(params["b1"])

    w_ih, w_hh = params["w_ih"], params["w_hh"]
    b_ih, b_hh = params["b_ih"], params["b_hh"]
    # Stacked gate weight: rows [x1-part ; h-part], lane blocks [r | z | i_n | h_n]
    wg = jnp.zeros((2 * Hp, 4 * Hp), jnp.float32)
    wg = wg.at[:H, 0 * Hp:0 * Hp + H].set(w_ih[:, 0:H])                 # i_r
    wg = wg.at[:H, 1 * Hp:1 * Hp + H].set(w_ih[:, H:2 * H])             # i_z
    wg = wg.at[:H, 2 * Hp:2 * Hp + H].set(w_ih[:, 2 * H:3 * H])         # i_n
    wg = wg.at[Hp:Hp + H, 0 * Hp:0 * Hp + H].set(w_hh[:, 0:H])          # h_r
    wg = wg.at[Hp:Hp + H, 1 * Hp:1 * Hp + H].set(w_hh[:, H:2 * H])      # h_z
    wg = wg.at[Hp:Hp + H, 3 * Hp:3 * Hp + H].set(w_hh[:, 2 * H:3 * H])  # h_n
    bg = jnp.zeros((1, 4 * Hp), jnp.float32)
    bg = bg.at[0, 0 * Hp:0 * Hp + H].set(b_ih[0:H] + b_hh[0:H])          # r
    bg = bg.at[0, 1 * Hp:1 * Hp + H].set(b_ih[H:2 * H] + b_hh[H:2 * H])  # z
    bg = bg.at[0, 2 * Hp:2 * Hp + H].set(b_ih[2 * H:3 * H])              # i_n
    bg = bg.at[0, 3 * Hp:3 * Hp + H].set(b_hh[2 * H:3 * H])              # h_n

    w2 = jnp.zeros((Hp, Ap), jnp.float32).at[:H, :A].set(params["w2"])
    b2 = jnp.zeros((1, Ap), jnp.float32).at[0, :A].set(params["b2"])

    return {
        "w1": w1.astype(jnp.bfloat16), "b1": b1,
        "wg": wg.astype(jnp.bfloat16), "bg": bg,
        "w2": w2.astype(jnp.bfloat16), "b2": b2,
        "E": E, "H": H, "A": A, "Hp": Hp, "Ap": Ap,
    }


# ----------------------------------------------------------------------------
# Forward passes
# ----------------------------------------------------------------------------
def init_hidden(n_rows, packed):
    """Persistent hidden state in the padded kernel layout (episode reset)."""
    return jnp.zeros((n_rows, packed["Hp"]), jnp.float32)


def export_hidden(h_pad, b, a, packed):
    """Slice the padded hidden state back to the logical (b, a, H) layout."""
    return h_pad[:, :packed["H"]].reshape(b, a, packed["H"])


def _choose_tile_n(n_rows, requested):
    # Rows per grid step: multiple of 16 sublanes, and keep >= 2 grid steps
    # whenever possible so the "parallel" axis splits across v7x's two TCs.
    requested = max(16, _round_up(requested, 16))
    half = max(16, _round_up(pl.cdiv(n_rows, 2), 16))
    return min(requested, half)


def rnn_agent_step(x, h_pad, packed, *, tile_n=512):
    """Core kernel step on flattened rows (fast path).

    x:     (N, E)  observations (any float dtype; cast to bf16 in-kernel).
    h_pad: (N, Hp) f32 persistent hidden state in kernel layout (lane-padded).
    Returns (q_pad (N, Ap) f32, h_pad_new (N, Hp) f32).  h_pad is aliased to
    h_pad_new; donate it at the jax.jit boundary for a true in-place update.
    """
    N, E = x.shape
    Hp, Ap = packed["Hp"], packed["Ap"]
    h_pad = h_pad.astype(jnp.float32)

    tile_n = _choose_tile_n(N, tile_n)
    grid = (pl.cdiv(N, tile_n),)        # ragged final block handled by Pallas

    row_spec = lambda cols: pl.BlockSpec((tile_n, cols), lambda i: (i, 0))
    full_spec = lambda arr: pl.BlockSpec(arr.shape, lambda i: (0, 0))

    weights = (packed["w1"], packed["b1"], packed["wg"], packed["bg"],
               packed["w2"], packed["b2"])
    weight_bytes = sum(int(w.nbytes) for w in weights)

    cost = pl.CostEstimate(
        flops=2 * N * (E * Hp + 2 * Hp * 4 * Hp + Hp * Ap),
        transcendentals=5 * N * Hp,
        bytes_accessed=int(x.nbytes) + 2 * int(h_pad.nbytes) + weight_bytes
                       + N * Ap * 4,
    )

    # VMEM budget: streamed tiles double-buffered; weights resident but still
    # counted twice by the pipeliner.  v5e scoped default is 16 MiB; keep the
    # request <= 48 MiB so it also fits v7x's 64 MiB physical VMEM.
    stream_bytes = (2 * tile_n * (E * x.dtype.itemsize + Hp * 4)
                    + 2 * tile_n * (Ap * 4 + Hp * 4))
    vmem_limit = int(min(max(2 * (stream_bytes + 2 * weight_bytes) + (4 << 20),
                             16 << 20), 48 << 20))
    # TODO(synk): for large hidden dims, single-buffer the weight BlockSpecs
    # (pipeline_mode=pl.Buffered(1)) to halve their VMEM footprint on v7x.

    q_pad, h_pad_new = pl.pallas_call(
        rnn_agent_kernel,
        grid=grid,
        in_specs=[
            row_spec(E),                  # x   (streams)
            row_spec(Hp),                 # h   (streams, aliased to h_new)
            full_spec(packed["w1"]), full_spec(packed["b1"]),
            full_spec(packed["wg"]), full_spec(packed["bg"]),
            full_spec(packed["w2"]), full_spec(packed["b2"]),
        ],
        out_specs=(row_spec(Ap), row_spec(Hp)),
        out_shape=(
            jax.ShapeDtypeStruct((N, Ap), jnp.float32),
            jax.ShapeDtypeStruct((N, Hp), jnp.float32),
        ),
        input_output_aliases={1: 1},      # hidden state updated in place
        compiler_params=pltpu.CompilerParams(
            dimension_semantics=("parallel",),
            vmem_limit_bytes=vmem_limit),
        cost_estimate=cost,
    )(x, h_pad, *weights)
    return q_pad, h_pad_new


def rnn_agent_forward(inputs, hidden_state, packed, *, tile_n=512):
    """Module-compatible forward: inputs (b,a,E), hidden_state (b,a,H) or None.

    Returns (q (b,a,A), h_new (b,a,H)), matching RNNAgent.forward.
    """
    b, a, e = inputs.shape
    H, A, Hp = packed["H"], packed["A"], packed["Hp"]
    N = b * a
    x = inputs.reshape(N, e)
    if hidden_state is None:
        h_pad = jnp.zeros((N, Hp), jnp.float32)
    else:
        h_pad = jnp.zeros((N, Hp), jnp.float32).at[:, :H].set(
            hidden_state.reshape(N, H).astype(jnp.float32))
    q_pad, h_pad_new = rnn_agent_step(x, h_pad, packed, tile_n=tile_n)
    return q_pad[:, :A].reshape(b, a, A), h_pad_new[:, :H].reshape(b, a, H)


# ----------------------------------------------------------------------------
# Pure-JAX reference (PyTorch GRUCell semantics) for correctness checking
# ----------------------------------------------------------------------------
def rnn_agent_reference(inputs, hidden_state, params):
    b, a, e = inputs.shape
    H = params["w1"].shape[1]
    A = params["w2"].shape[1]
    x = inputs.reshape(-1, e)
    x1 = jnp.maximum(x @ params["w1"] + params["b1"], 0.0)
    h = hidden_state.reshape(-1, H)
    gi = x1 @ params["w_ih"] + params["b_ih"]
    gh = h @ params["w_hh"] + params["b_hh"]
    r = jax.nn.sigmoid(gi[:, :H] + gh[:, :H])
    z = jax.nn.sigmoid(gi[:, H:2 * H] + gh[:, H:2 * H])
    n = jnp.tanh(gi[:, 2 * H:] + r * gh[:, 2 * H:])
    h_new = (1.0 - z) * n + z * h
    q = h_new @ params["w2"] + params["b2"]
    return q.reshape(b, a, A), h_new.reshape(b, a, H)


# ----------------------------------------------------------------------------
if __name__ == "__main__":
    b, a, e = 4, 8, 32            # batch, n_agents, obs features  (N = 32 rows)
    hidden_dim, n_actions = 32, 8

    key = jax.random.PRNGKey(0)
    k_in, k_h, k_p = jax.random.split(key, 3)

    inputs = jax.random.normal(k_in, (b, a, e), dtype=jnp.float32)
    hidden = jax.random.normal(k_h, (b, a, hidden_dim), dtype=jnp.float32)
    # adj is accepted by the PyTorch forward but unused; kept for signature parity.
    adj = jnp.zeros((b, a, a), dtype=jnp.float32)  # noqa: F841

    params = init_params(k_p, e, hidden_dim, n_actions)
    packed = prepare_weights(params)

    # --- Module-compatible path (returns the PyTorch (b, a, *) shapes). -----
    # tile_n=16 -> 2-step grid even at this toy N, exercising the row pipeline.
    q, h_new = rnn_agent_forward(inputs, hidden, packed, tile_n=16)
    jax.block_until_ready((q, h_new))
    assert q.shape == (b, a, n_actions)
    assert h_new.shape == (b, a, hidden_dim)

    # Numerics vs a pure-JAX f32 reference (bf16 weights + approx sigmoid).
    q_ref, h_ref = rnn_agent_reference(inputs, hidden, params)
    assert jnp.allclose(q, q_ref, atol=3e-2, rtol=3e-2)
    assert jnp.allclose(h_new, h_ref, atol=3e-2, rtol=3e-2)

    # --- Fast path: persistent padded hidden state, donated in-place. -------
    step = jax.jit(functools.partial(rnn_agent_step, packed=packed, tile_n=16),
                   donate_argnums=(1,))
    x_flat = inputs.reshape(b * a, e)
    h_pad = init_hidden(b * a, packed)        # episode reset
    for _ in range(3):                        # a few env steps reusing the buffer
        q_pad, h_pad = step(x_flat, h_pad)
    jax.block_until_ready((q_pad, h_pad))
    q2 = q_pad[:, :n_actions].reshape(b, a, n_actions)
    h2 = export_hidden(h_pad, b, a, packed)
    assert q2.shape == (b, a, n_actions) and h2.shape == (b, a, hidden_dim)
    assert bool(jnp.all(jnp.isfinite(q2))) and bool(jnp.all(jnp.isfinite(h2)))

    print("KERNEL_OK")
</pallas_src>

<mosaic_0001>
module attributes {stable_mosaic.version = 11 : i64} {
  func.func @rnn_agent_kernel(%arg0: i32, %arg1: memref<16x32xf32, #tpu.memory_space<vmem>>, %arg2: memref<16x128xf32, #tpu.memory_space<vmem>>, %arg3: memref<32x128xbf16, #tpu.memory_space<vmem>>, %arg4: memref<1x128xf32, #tpu.memory_space<vmem>>, %arg5: memref<256x512xbf16, #tpu.memory_space<vmem>>, %arg6: memref<1x512xf32, #tpu.memory_space<vmem>>, %arg7: memref<128x128xbf16, #tpu.memory_space<vmem>>, %arg8: memref<1x128xf32, #tpu.memory_space<vmem>>, %arg9: memref<16x128xf32, #tpu.memory_space<vmem>>, %arg10: memref<16x128xf32, #tpu.memory_space<vmem>>) attributes {dimension_semantics = [#tpu.dimension_semantics<parallel>], iteration_bounds = array<i64: 2>, scalar_prefetch = 0 : i64, scratch_operands = 0 : i64, tpu.core_type = #tpu.core_type<tc>, window_params = [{transform_indices = @transform_0, window_bounds = array<i64: 16, 32>}, {transform_indices = @transform_1, window_bounds = array<i64: 16, 128>}, {pipeline_mode = #tpu.pipeline_mode<synchronous>, transform_indices = @transform_2, window_bounds = array<i64: 32, 128>}, {pipeline_mode = #tpu.pipeline_mode<synchronous>, transform_indices = @transform_3, window_bounds = array<i64: 1, 128>}, {pipeline_mode = #tpu.pipeline_mode<synchronous>, transform_indices = @transform_4, window_bounds = array<i64: 256, 512>}, {pipeline_mode = #tpu.pipeline_mode<synchronous>, transform_indices = @transform_5, window_bounds = array<i64: 1, 512>}, {pipeline_mode = #tpu.pipeline_mode<synchronous>, transform_indices = @transform_6, window_bounds = array<i64: 128, 128>}, {pipeline_mode = #tpu.pipeline_mode<synchronous>, transform_indices = @transform_7, window_bounds = array<i64: 1, 128>}, {transform_indices = @transform_8, window_bounds = array<i64: 16, 128>}, {transform_indices = @transform_9, window_bounds = array<i64: 16, 128>}]} {
    %c0 = arith.constant 0 : index
    %c0_0 = arith.constant 0 : index
    %0 = vector.load %arg2[%c0, %c0_0] : memref<16x128xf32, #tpu.memory_space<vmem>>, vector<16x128xf32>
    %1 = arith.truncf %0 : vector<16x128xf32> to vector<16x128xbf16>
    %c0_1 = arith.constant 0 : index
    %c0_2 = arith.constant 0 : index
    %2 = vector.load %arg1[%c0_1, %c0_2] : memref<16x32xf32, #tpu.memory_space<vmem>>, vector<16x32xf32>
    %3 = arith.truncf %2 : vector<16x32xf32> to vector<16x32xbf16>
    %c0_3 = arith.constant 0 : index
    %c0_4 = arith.constant 0 : index
    %4 = vector.load %arg3[%c0_3, %c0_4] : memref<32x128xbf16, #tpu.memory_space<vmem>>, vector<32x128xbf16>
    %cst = arith.constant dense<0.000000e+00> : vector<16x128xf32>
    %5 = tpu.matmul %3, %4, %cst {dimension_numbers = #tpu.dot_dimension_numbers<[1], [0], [0], [1], [0, 0, 1, 1], [], []>} : vector<16x32xbf16>, vector<32x128xbf16>, vector<16x128xf32> -> vector<16x128xf32>
    %c0_5 = arith.constant 0 : index
    %c0_6 = arith.constant 0 : index
    %6 = vector.load %arg4[%c0_5, %c0_6] : memref<1x128xf32, #tpu.memory_space<vmem>>, vector<1x128xf32>
    %7 = vector.broadcast %6 : vector<1x128xf32> to vector<16x128xf32>
    %8 = arith.addf %5, %7 : vector<16x128xf32>
    %cst_7 = arith.constant 0.000000e+00 : f32
    %9 = vector.broadcast %cst_7 : f32 to vector<16x128xf32>
    %10 = arith.maximumf %8, %9 : vector<16x128xf32>
    %11 = arith.truncf %10 : vector<16x128xf32> to vector<16x128xbf16>
    %c0_8 = arith.constant 0 : index
    %c0_9 = arith.constant 0 : index
    %12 = vector.load %arg5[%c0_8, %c0_9] : memref<256x512xbf16, #tpu.memory_space<vmem>>, vector<128x512xbf16>
    %cst_10 = arith.constant dense<0.000000e+00> : vector<16x512xf32>
    %13 = tpu.matmul %11, %12, %cst_10 {dimension_numbers = #tpu.dot_dimension_numbers<[1], [0], [0], [1], [0, 0, 1, 1], [], []>} : vector<16x128xbf16>, vector<128x512xbf16>, vector<16x512xf32> -> vector<16x512xf32>
    %c128 = arith.constant 128 : index
    %c0_11 = arith.constant 0 : index
    %14 = vector.load %arg5[%c128, %c0_11] : memref<256x512xbf16, #tpu.memory_space<vmem>>, vector<128x512xbf16>
    %cst_12 = arith.constant dense<0.000000e+00> : vector<16x512xf32>
    %15 = tpu.matmul %1, %14, %cst_12 {dimension_numbers = #tpu.dot_dimension_numbers<[1], [0], [0], [1], [0, 0, 1, 1], [], []>} : vector<16x128xbf16>, vector<128x512xbf16>, vector<16x512xf32> -> vector<16x512xf32>
    %16 = arith.addf %13, %15 : vector<16x512xf32>
    %c0_13 = arith.constant 0 : index
    %c0_14 = arith.constant 0 : index
    %17 = vector.load %arg6[%c0_13, %c0_14] : memref<1x512xf32, #tpu.memory_space<vmem>>, vector<1x512xf32>
    %18 = vector.broadcast %17 : vector<1x512xf32> to vector<16x512xf32>
    %19 = arith.addf %16, %18 : vector<16x512xf32>
    %20 = vector.extract_strided_slice %19 {offsets = [0, 0], sizes = [16, 128], strides = [1, 1]} : vector<16x512xf32> to vector<16x128xf32>
    %cst_15 = arith.constant 0.000000e+00 : f32
    %21 = vector.broadcast %cst_15 : f32 to vector<16x128xf32>
    %22 = arith.subf %21, %20 : vector<16x128xf32>
    %23 = math.exp %22 : vector<16x128xf32>
    %cst_16 = arith.constant 1.000000e+00 : f32
    %24 = vector.broadcast %cst_16 : f32 to vector<16x128xf32>
    %25 = arith.addf %24, %23 : vector<16x128xf32>
    %26 = tpu.reciprocal %25 {approx = true} : vector<16x128xf32> -> vector<16x128xf32>
    %27 = vector.extract_strided_slice %19 {offsets = [0, 128], sizes = [16, 128], strides = [1, 1]} : vector<16x512xf32> to vector<16x128xf32>
    %cst_17 = arith.constant 0.000000e+00 : f32
    %28 = vector.broadcast %cst_17 : f32 to vector<16x128xf32>
    %29 = arith.subf %28, %27 : vector<16x128xf32>
    %30 = math.exp %29 : vector<16x128xf32>
    %cst_18 = arith.constant 1.000000e+00 : f32
    %31 = vector.broadcast %cst_18 : f32 to vector<16x128xf32>
    %32 = arith.addf %31, %30 : vector<16x128xf32>
    %33 = tpu.reciprocal %32 {approx = true} : vector<16x128xf32> -> vector<16x128xf32>
    %34 = vector.extract_strided_slice %19 {offsets = [0, 256], sizes = [16, 128], strides = [1, 1]} : vector<16x512xf32> to vector<16x128xf32>
    %35 = vector.extract_strided_slice %19 {offsets = [0, 384], sizes = [16, 128], strides = [1, 1]} : vector<16x512xf32> to vector<16x128xf32>
    %36 = arith.mulf %26, %35 : vector<16x128xf32>
    %37 = arith.addf %34, %36 : vector<16x128xf32>
    %38 = math.tanh %37 : vector<16x128xf32>
    %39 = arith.subf %0, %38 : vector<16x128xf32>
    %40 = arith.mulf %33, %39 : vector<16x128xf32>
    %41 = arith.addf %38, %40 : vector<16x128xf32>
    %42 = arith.truncf %41 : vector<16x128xf32> to vector<16x128xbf16>
    %c0_19 = arith.constant 0 : index
    %c0_20 = arith.constant 0 : index
    %43 = vector.load %arg7[%c0_19, %c0_20] : memref<128x128xbf16, #tpu.memory_space<vmem>>, vector<128x128xbf16>
    %cst_21 = arith.constant dense<0.000000e+00> : vector<16x128xf32>
    %44 = tpu.matmul %42, %43, %cst_21 {dimension_numbers = #tpu.dot_dimension_numbers<[1], [0], [0], [1], [0, 0, 1, 1], [], []>} : vector<16x128xbf16>, vector<128x128xbf16>, vector<16x128xf32> -> vector<16x128xf32>
    %c0_22 = arith.constant 0 : index
    %c0_23 = arith.constant 0 : index
    %45 = vector.load %arg8[%c0_22, %c0_23] : memref<1x128xf32, #tpu.memory_space<vmem>>, vector<1x128xf32>
    %46 = vector.broadcast %45 : vector<1x128xf32> to vector<16x128xf32>
    %47 = arith.addf %44, %46 : vector<16x128xf32>
    %c0_24 = arith.constant 0 : index
    %c0_25 = arith.constant 0 : index
    %48 = vector.load %arg9[%c0_24, %c0_25] : memref<16x128xf32, #tpu.memory_space<vmem>>, vector<16x128xf32>
    tpu.vector_store %arg9[%c0_24, %c0_25], %47 {strides = array<i32>} : memref<16x128xf32, #tpu.memory_space<vmem>>, vector<16x128xf32>,
    %c0_26 = arith.constant 0 : index
    %c0_27 = arith.constant 0 : index
    %49 = vector.load %arg10[%c0_26, %c0_27] : memref<16x128xf32, #tpu.memory_space<vmem>>, vector<16x128xf32>
    tpu.vector_store %arg10[%c0_26, %c0_27], %41 {strides = array<i32>} : memref<16x128xf32, #tpu.memory_space<vmem>>, vector<16x128xf32>,
    return
  }
  func.func @transform_0(%arg0: i32) -> (i32, i32) {
    %c0_i32 = arith.constant 0 : i32
    %c0_i32_0 = arith.constant 0 : i32
    return %arg0, %c0_i32 : i32, i32
  }
  func.func @transform_1(%arg0: i32) -> (i32, i32) {
    %c0_i32 = arith.constant 0 : i32
    %c0_i32_0 = arith.constant 0 : i32
    return %arg0, %c0_i32 : i32, i32
  }
  func.func @transform_2(%arg0: i32) -> (i32, i32) {
    %c0_i32 = arith.constant 0 : i32
    %c0_i32_0 = arith.constant 0 : i32
    %c0_i32_1 = arith.constant 0 : i32
    return %c0_i32, %c0_i32_0 : i32, i32
  }
  func.func @transform_3(%arg0: i32) -> (i32, i32) {
    %c0_i32 = arith.constant 0 : i32
    %c0_i32_0 = arith.constant 0 : i32
    %c0_i32_1 = arith.constant 0 : i32
    return %c0_i32, %c0_i32_0 : i32, i32
  }
  func.func @transform_4(%arg0: i32) -> (i32, i32) {
    %c0_i32 = arith.constant 0 : i32
    %c0_i32_0 = arith.constant 0 : i32
    %c0_i32_1 = arith.constant 0 : i32
    return %c0_i32, %c0_i32_0 : i32, i32
  }
  func.func @transform_5(%arg0: i32) -> (i32, i32) {
    %c0_i32 = arith.constant 0 : i32
    %c0_i32_0 = arith.constant 0 : i32
    %c0_i32_1 = arith.constant 0 : i32
    return %c0_i32, %c0_i32_0 : i32, i32
  }
  func.func @transform_6(%arg0: i32) -> (i32, i32) {
    %c0_i32 = arith.constant 0 : i32
    %c0_i32_0 = arith.constant 0 : i32
    %c0_i32_1 = arith.constant 0 : i32
    return %c0_i32, %c0_i32_0 : i32, i32
  }
  func.func @transform_7(%arg0: i32) -> (i32, i32) {
    %c0_i32 = arith.constant 0 : i32
    %c0_i32_0 = arith.constant 0 : i32
    %c0_i32_1 = arith.constant 0 : i32
    return %c0_i32, %c0_i32_0 : i32, i32
  }
  func.func @transform_8(%arg0: i32) -> (i32, i32) {
    %c0_i32 = arith.constant 0 : i32
    %c0_i32_0 = arith.constant 0 : i32
    return %arg0, %c0_i32 : i32, i32
  }
  func.func @transform_9(%arg0: i32) -> (i32, i32) {
    %c0_i32 = arith.constant 0 : i32
    %c0_i32_0 = arith.constant 0 : i32
    return %arg0, %c0_i32 : i32, i32
  }
}

</mosaic_0001>

<bundles_post_ra>
// kernel: tpu_custom_call.1
= control target key start
LH: loop header
LB: loop body
LE: loop exit
PB: predicated region body
PF: predicated region fallthrough
CT: control target
= control target key end

     0   :  { %s2568_s0 = inlined_call_operand.hbm [shape: f32[32,32], index: 0, kind: input, shape index: {}]   ;;  %s2569_s1 = inlined_call_operand.hbm [shape: f32[32,128], index: 1, kind: input, shape index: {}, may-alias: {1,9}]   ;;  %s2570_s2 = inlined_call_operand.hbm [shape: bf16[32,128], index: 2, kind: input, shape index: {}]   ;;  %s2571_s3 = inlined_call_operand.vmem [shape: f32[1,128], index: 3, kind: input, shape index: {}]   ;;  %s2572_s4 = inlined_call_operand.hbm [shape: bf16[256,512], index: 4, kind: input, shape index: {}]   ;;  %s2573_s5 = inlined_call_operand.hbm [shape: f32[1,512], index: 5, kind: input, shape index: {}]   ;;  %s2574_s6 = inlined_call_operand.vmem [shape: bf16[128,128], index: 6, kind: input, shape index: {}]   ;;  %s2575_s7 = inlined_call_operand.hbm [shape: f32[1,128], index: 7, kind: input, shape index: {}]   ;;  %s2576_s8 = inlined_call_operand.hbm [shape: f32[32,128], index: 8, kind: output, shape index: {0}]   ;;  %s2577_s9 = inlined_call_operand.hbm [shape: f32[32,128], index: 9, kind: output, shape index: {1}, may-alias: {1,9}]  }
   0x1   :  { %2582 = sst [smem:[#allocation24_spill]] %s2568_s0 }
   0x2   :  { %2583 = sst [smem:[#allocation25_spill]] %s2570_s2 }
   0x3   :  { %2584 = sst [smem:[#allocation26_spill]] %s2572_s4 }
   0x4   :  { %2585 = sst [smem:[#allocation27_spill]] %s2573_s5 }
   0x5   :  { %2586 = sst [smem:[#allocation28_spill]] %s2575_s7 }
   0x6   :  { %15 = vsyncpa [#allocation3], 0 }
   0x7   :  { %17 = vsyncpa [#allocation3 + $0x1], 0 }
   0x8   :  { %18 = vsyncpa [#allocation6], 0 }
   0x9   :  { %20 = vsyncpa [#allocation6 + $0x1], 0 }
   0xa   :  { %21 = vsyncpa [#allocation9], 0 }
   0xb   :  { %22 = vsyncpa [#allocation12], 0 }
   0xc   :  { %23 = vsyncpa [#allocation4], 0 }
   0xd   :  { %25 = vsyncpa [#allocation4 + $0x1], 0 }
   0xe   :  { %26 = vsyncpa [#allocation15], 0 }
   0xf   :  { %28 = vsyncpa [#allocation15 + $0x1], 0  ;;  %s2200_s30 = smov 0   ;;  %s2202_s10 = smov 0  }
  0x10   :  { %s2204_s11 = smov 0   ;;  %s2206_s12 = smov 0  }
  0x11 LB: > { %s2221_s13 = sadd.s32 4294967295, %s2129_s12   ;;  %s1474_s14 = sadd.s32 4294967294, %s2129_s12   ;;  %s2129_s12 = sphi %s2206_s12, %s2615_s12   ;;  %s2125_s11 = sphi %s2204_s11, %s2614_s11   ;;  %s2121_s10 = sphi %s2202_s10, %s2613_s10   ;;  %s2117_s30 = sphi %s2200_s30, %s2612_s30  }
  0x12   : > { %p54_p0 = scmp.ne.s32.totalorder %s2121_s10, %s2117_s30  ;;  %p2578_p1 = scmp.eq.s32.totalorder %s2221_s13, 0 }
  0x13   : > { %p236_p3 = scmp.eq.s32.totalorder %s1474_s14, 1  ;;  %p1475_p5 = scmp.ge.s32.totalorder %s2129_s12, 1 }
  0x14   : > { %p2230_p4 = por %p2578_p1, %p54_p0  ;;  %p269_p7 = scmp.lt.s32.totalorder %s2129_s12, 3 }
  0x15   : > { %p2235_p6 = por %p236_p3, %p54_p0  ;;  %s2131_s18 = smov [#allocation7]  }
  0x16   : > { %s2587_s15 = scalar_select %p2230_p4, 1, 0 }
  0x17   : > { %s2588_s16 = scalar_select %p2235_p6, 1, 0 }
  0x18   : > { %p2240_p8 = pnand %p1475_p5, %p269_p7  ;;  %s281_s19 = sshll.u32 %s2131_s18, 4  ;;  %s282_s19 = int_to_ptr.vmem [resolvable:$true] %s281_s19 }
  0x19   : > { %s2132_s21 = smov [#allocation8]   ;;  %s1870_s23 = scalar_lea.vmem %s282_s19, 256 }
  0x1a   : > { %p1649_p9 = pneg %p2240_p8  ;;  %s297_s22 = sshll.u32 %s2132_s21, 4  ;;  %s298_s22 = int_to_ptr.vmem [resolvable:$true] %s297_s22 }
  0x1b   : > { %p1871_p13 = scmp.ne.s32.totalorder %s282_s19, %s1870_s23  ;;  %p1878_p5 = scmp.lt.s32.totalorder %s282_s19, %s282_s19 }
  0x1c   : > { %p2249_p11 = pnand %p1649_p9, %p2578_p1  ;;  %p1879_p7 = scmp.lt.s32.totalorder %s1870_s23, %s1870_s23 }
  0x1e   : > { %p1861_p12 = pneg %p2249_p11  ;;  %p1880_p10 = por %p1879_p7, %p1878_p5 }
  0x20   : > { %p1873_p0 = pnand %p1871_p13, %p1861_p12 }
  0x22   : > { %p1874_p3 = pneg %p1873_p0 }
  0x24   : > { %p1881_p9 = pnand %p1880_p10, %p1874_p3 }
  0x26   : > { %1884 = shalt.err (!%p1881_p9)
}
  0x27   : > { %s2133_s24 = smov 64   ;;  %s2134_s25 = smov 4  }
  0x28   : > { %s2591_s2 = sld [smem:[#allocation25_spill]]  ;;  %s1896_s28 = scalar_lea.vmem %s298_s22, 8192 }
  0x29   : > { %p1897_p1 = scmp.ne.s32.totalorder %s298_s22, %s1896_s28  ;;  %p1904_p2 = scmp.lt.s32.totalorder %s298_s22, %s298_s22 }
  0x2a   : > { %p1905_p6 = scmp.lt.s32.totalorder %s1896_s28, %s1896_s28 }
  0x2b   : > { %p1899_p13 = pnand %p1897_p1, %p1861_p12 }
  0x2c   : > { %p1906_p5 = por %p1905_p6, %p1904_p2 }
  0x2d   : > { %p1900_p0 = pneg %p1899_p13 }
  0x2e   : > { %1652 = dma.hbm_to_vmem [thread:$0]  (!%p2249_p11), %s2591_s2, 256, %s282_s19, [#allocation6], %s2133_s24, %s2133_s24, %s2134_s25  }
  0x2f   : > { %p1907_p10 = pnand %p1906_p5, %p1900_p0 }
  0x31   : > { %1910 = shalt.err (!%p1907_p10)
}
  0x32   : > { %s2135_s29 = smov 256   ;;  %s2136_s14 = smov 16  }
  0x33   : > { %s2592_s4 = sld [smem:[#allocation26_spill]]  ;;  %s2137_s19 = smov [#allocation10]  }
  0x34   : > { %s311_s23 = sshll.u32 %s2137_s19, 4  ;;  %s2138_s24 = smov [#allocation11]   ;;  %s312_s23 = int_to_ptr.vmem [resolvable:$true] %s311_s23 }
  0x35   : > { %s325_s25 = sshll.u32 %s2138_s24, 4  ;;  %s1922_s26 = scalar_lea.vmem %s312_s23, 64  ;;  %s326_s25 = int_to_ptr.vmem [resolvable:$true] %s325_s25 }
  0x36   : > { %p1923_p1 = scmp.ne.s32.totalorder %s312_s23, %s1922_s26  ;;  %p1930_p3 = scmp.lt.s32.totalorder %s312_s23, %s312_s23 }
  0x37   : > { %p1931_p7 = scmp.lt.s32.totalorder %s1922_s26, %s1922_s26 }
  0x38   : > { %p1925_p2 = pnand %p1923_p1, %p1861_p12 }
  0x39   : > { %1655 = dma.hbm_to_vmem [thread:$0]  (!%p2249_p11), %s2592_s4, 8192, %s298_s22, [#allocation9], %s2135_s29, %s2135_s29, %s2136_s14  }
  0x3a   : > { %p1926_p6 = pneg %p1925_p2  ;;  %p1932_p9 = por %p1931_p7, %p1930_p3 }
  0x3c   : > { %p1933_p13 = pnand %p1932_p9, %p1926_p6 }
  0x3e   : > { %1936 = shalt.err (!%p1933_p13)
}
  0x3f   : > { %s2593_s5 = sld [smem:[#allocation27_spill]]  ;;  %s1948_s28 = scalar_lea.vmem %s326_s25, 16 }
  0x40   : > { %p1949_p0 = scmp.ne.s32.totalorder %s326_s25, %s1948_s28  ;;  %s1955_s29 = scalar_lea.vmem %s326_s25, 32 }
  0x41   : > { %p1956_p1 = scmp.lt.s32.totalorder %s326_s25, %s326_s25  ;;  %p1957_p2 = scmp.lt.s32.totalorder %s1955_s29, %s1948_s28 }
  0x42   : > { %p1951_p5 = pnand %p1949_p0, %p1861_p12 }
  0x43   : > { %p1958_p4 = por %p1957_p2, %p1956_p1 }
  0x44   : > { %p1952_p10 = pneg %p1951_p5 }
  0x45   : > { %1658 = dma.hbm_to_vmem [thread:$0]  (!%p2249_p11), %s2593_s5, 64, %s312_s23, [#allocation9]  }
  0x46   : > { %p1959_p3 = pnand %p1958_p4, %p1952_p10 }
  0x48   : > { %1962 = shalt.err (!%p1959_p3)
}
  0x49   : > { %s2594_s7 = sld [smem:[#allocation28_spill]]  ;;  %s2288_s21 = sadd.s32 1, %s2129_s12  }
  0x4a   : > { %s38_s20 = ssub.s32 %s2129_s12, %s2288_s21  ;;  %s41_s19 = sadd.s32 1, %s2125_s11 }
  0x4b   : > { %p39_p4 = scmp.eq.s32.totalorder %s38_s20, 0  ;;  %p48_p12 = scmp.ne.s32.totalorder %s2125_s11, %s2121_s10 }
  0x4c   : > { %p49_p6 = scmp.eq.s32.totalorder %s2129_s12, 0  ;;  %p2596_p9 = scmp.eq.s32.totalorder %s2221_s13, 1 }
  0x4d   : > { %s2297_s23 = scalar_select %p39_p4, %s2125_s11, %s41_s19  }
  0x4e   : > { %p50_p7 = por %p49_p6, %p48_p12  ;;  %p2301_p13 = por %p2596_p9, %p48_p12 }
  0x4f   : > { %1661 = dma.hbm_to_vmem [thread:$0]  (!%p2249_p11), %s2594_s7, 16, %s326_s25, [#allocation12]  }
  0x50   : > { %2595 = sst [smem:[#allocation23_spill]] %s2297_s23  ;;  %p1680_p0 = scmp.lt.s32.totalorder %s2129_s12, 2 }
  0x51   : > { %s2597_s24 = scalar_select %p2301_p13, 1, 0 }
  0x52   : > { %s336_s26 = sand.u32 1, %s2125_s11   ;;  %s2580_s25 = sshll.u32 %s2129_s12, 8 }
  0x53   : > { %s2307_s22 = sshll.u32 %s336_s26, 4  ;;  %s2598_s0 = sld [smem:[#allocation24_spill]] }
  0x54   : > { %s340_s14 = scalar_lea.vmem [#allocation2], %s2307_s22  ;;  %p2320_p11 = pnand %p1680_p0, %p50_p7 }
  0x55   : > { %s347_s18 = sshll.u32 %s340_s14, 4  ;;  %s2324_s19 = scalar_lea.sflag [#allocation3], %s336_s26  ;;  %s2318_s18 = int_to_ptr.vmem [resolvable:$true] %s347_s18 }
  0x56   : > { %p1965_p10 = pneg %p2320_p11 }
  0x59   : > { %s2315_s29 = scalar_lea.hbm %s2598_s0, %s2580_s25  ;;  %s1968_s14 = scalar_lea.hbm %s2598_s0, 512 }
  0x5a   : > { %s1963_s2 = scalar_lea.hbm %s2315_s29, 256  ;;  %p1969_p3 = scmp.lt.s32.totalorder %s2315_s29, %s2598_s0 }
  0x5b   : > { %p1964_p5 = scmp.ne.s32.totalorder %s2315_s29, %s1963_s2  ;;  %p1970_p4 = scmp.lt.s32.totalorder %s1968_s14, %s1963_s2 }
  0x5d   : > { %p1966_p1 = pnand %p1965_p10, %p1964_p5  ;;  %p1971_p12 = por %p1970_p4, %p1969_p3 }
  0x5f   : > { %p1967_p2 = pneg %p1966_p1 }
  0x61   : > { %p1972_p6 = pnand %p1971_p12, %p1967_p2 }
  0x63   : > { %1975 = shalt.err (!%p1972_p6)
}
  0x64   : > { %s1976_s26 = scalar_lea.vmem %s2318_s18, 256  ;;  %s2139_s27 = smov [#allocation2]  }
  0x65   : > { %p1977_p7 = scmp.ne.s32.totalorder %s2318_s18, %s1976_s26  ;;  %s1981_s28 = sshll.u32 %s2139_s27, 4  ;;  %s1982_s28 = int_to_ptr.vmem [resolvable:$false] %s1981_s28 }
  0x66   : > { %s1983_s5 = scalar_lea.vmem %s1982_s28, 512  ;;  %p1984_p5 = scmp.lt.s32.totalorder %s2318_s18, %s1982_s28 }
  0x67   : > { %p1979_p9 = pnand %p1977_p7, %p1965_p10  ;;  %p1985_p1 = scmp.lt.s32.totalorder %s1983_s5, %s1976_s26 }
  0x69   : > { %p1980_p0 = pneg %p1979_p9  ;;  %p1986_p13 = por %p1985_p1, %p1984_p5 }
  0x6b   : > { %p1987_p3 = pnand %p1986_p13, %p1980_p0 }
  0x6d   : > { %1990 = shalt.err (!%p1987_p3)
}
  0x6e   : > { %s2140_s2 = smov 128   ;;  %s2141_s4 = smov 8  }
  0x6f   : > { %1665 = dma.hbm_to_vmem [thread:$0]  (!%p2320_p11), %s2315_s29, 256, %s2318_s18, %s2324_s19, %s2140_s2, %s2140_s2, %s2141_s4  }
  0x70   : > { %s2600_s25 = sshll.u32 %s2129_s12, 8  ;;  %s361_s27 = scalar_lea.vmem [#allocation5], %s2307_s22 }
  0x71   : > { %s2359_s26 = scalar_lea.hbm %s2569_s1, %s2600_s25  ;;  %s368_s28 = sshll.u32 %s361_s27, 4  ;;  %s2362_s28 = int_to_ptr.vmem [resolvable:$true] %s368_s28 }
  0x72   : > { %s357_s0 = sand.u32 1, %s2129_s12   ;;  %s1991_s23 = scalar_lea.hbm %s2359_s26, 256 }
  0x73   : > { %s358_s7 = scalar_lea.sflag [#allocation6], %s357_s0  ;;  %p1992_p13 = scmp.ne.s32.totalorder %s2359_s26, %s1991_s23 }
  0x74   : > { %s1996_s19 = scalar_lea.hbm %s2569_s1, 512  ;;  %p1997_p12 = scmp.lt.s32.totalorder %s2359_s26, %s2569_s1 }
  0x75   : > { %p1994_p2 = pnand %p1992_p13, %p1965_p10  ;;  %p1998_p6 = scmp.lt.s32.totalorder %s1996_s19, %s1991_s23 }
  0x77   : > { %p1995_p4 = pneg %p1994_p2  ;;  %p1999_p7 = por %p1998_p6, %p1997_p12 }
  0x79   : > { %p2000_p9 = pnand %p1999_p7, %p1995_p4 }
  0x7b   : > { %2003 = shalt.err (!%p2000_p9)
}
  0x7c   : > { %s2004_s0 = scalar_lea.vmem %s2362_s28, 256  ;;  %s2142_s22 = smov [#allocation5]  }
  0x7d   : > { %p2005_p0 = scmp.ne.s32.totalorder %s2362_s28, %s2004_s0  ;;  %s2009_s14 = sshll.u32 %s2142_s22, 4  ;;  %s2010_s14 = int_to_ptr.vmem [resolvable:$false] %s2009_s14 }
  0x7e   : > { %s2011_s27 = scalar_lea.vmem %s2010_s14, 512  ;;  %p2012_p3 = scmp.lt.s32.totalorder %s2362_s28, %s2010_s14 }
  0x7f   : > { %p2007_p5 = pnand %p2005_p0, %p1965_p10  ;;  %p2013_p13 = scmp.lt.s32.totalorder %s2011_s27, %s2004_s0 }
  0x81   : > { %p2008_p1 = pneg %p2007_p5  ;;  %p2014_p2 = por %p2013_p13, %p2012_p3 }
  0x83   : > { %p2015_p12 = pnand %p2014_p2, %p2008_p1 }
  0x85   : > { %2018 = shalt.err (!%p2015_p12)
}
  0x86   : > { %1668 = dma.hbm_to_vmem [thread:$0]  (!%p2320_p11), %s2359_s26, 256, %s2362_s28, %s358_s7, %s2140_s2, %s2140_s2, %s2141_s4  }
  0x87   : > { %380 = sbr.rel (%p2240_p8) target bundleno = 838 (0x346), region = 52  ;;  %s2393_s23 = sand.u32 (!%p2240_p8), 1, %s2121_s10  }
  0x88   : > { %s2396_s29 = sshll.u32 (!%p2240_p8), %s2393_s23, 4  ;;  %s383_s18 = scalar_lea.sflag (!%p2240_p8), [#allocation3], %s2393_s23 }
  0x89   : > { %s386_s20 = scalar_lea.vmem (!%p2240_p8), [#allocation2], %s2396_s29  ;;  %p2601_p10 = scmp.ne.s32.totalorder (!%p2240_p8), %s2587_s15, 0 }
  0x8c   : > { %2088 = dma.done.wait (%p2601_p10), %s383_s18, 256  }
  0x8d   : > { %2090 = vsyncadd (%p2601_p10), %s383_s18, 4294967040  ;;  %s391_s7 = sand.u32 1, %s2221_s13   ;;  %s395_s2 = scalar_lea.vmem [#allocation5], %s2396_s29 }
  0x8e   : > { %s392_s17 = scalar_lea.sflag [#allocation6], %s391_s7 }
  0x8f   : > { %2092 = dma.done.wait (%p2601_p10), %s392_s17, 256  }
  0x90   : > { %2094 = vsyncadd (%p2601_p10), %s392_s17, 4294967040  ;;  %p2602_p8 = scmp.eq.s32.totalorder %s2221_s13, 0 }
  0x92   : > { %2096 = dma.done.wait (%p2602_p8), [#allocation6], 256   ;;  %p2603_p11 = pmov %p2602_p8 }
  0x93   : > { %p2604_p4 = pmov %p2602_p8 }
  0x94   : > { %2098 = vsyncadd (%p2603_p11), [#allocation6], 4294967040 }
  0x95   : > { %2100 = dma.done.wait (%p2604_p4), [#allocation9], 8256   ;;  %p2605_p6 = pmov %p2604_p4 }
  0x96   : > { %p2606_p7 = pmov %p2604_p4 }
  0x97   : > { %2102 = vsyncadd (%p2605_p6), [#allocation9], 4294959040 }
  0x98   : > { %2104 = dma.done.wait (%p2606_p7), [#allocation12], 16   ;;  %p2607_p9 = pmov %p2604_p4 }
  0x99   : > { %v2143_v0 = vmov 0.0   ;;  %vm2144_vm0 = vmmov 0   ;;  %v2145_v1 = vmov 0   ;;  %v1733_v2 = vld [vmem:[#allocation7 + $0x8] sm:$0xff]   ;;  %v1734_v3 = vld [vmem:[#allocation7] sm:$0xff]   ;;  %vm490_vm1 = vcmask 261120  }
  0x9a   : > { %2106 = vsyncadd (%p2607_p9), [#allocation12], 4294967280  ;;  %1597 = vmatprep.subr.bf16.mxu0 %v2143_v0  ;;  %1601 = vmatprep.mubr.msk.bf16.mxu0 %vm2144_vm0, %v2143_v0  ;;  %v464_v4 = vld [vmem:[%s386_s20] sm:$0xff]  ;;  %v465_v5 = vld [vmem:[%s386_s20 + $0x8] sm:$0xff]  ;;  %s455_s26 = scalar_lea.vmem [#allocation14], %s2396_s29  ;;  %s1583_s28 = sshll.u32 %s2221_s13, 8 }
  0x9b   : > { %794 = vmatprep.mubr.bf16.mxu1 %v2145_v1  ;;  %1598 = vmatpush3.bf16.msra.mxu0 %v1733_v2  ;;  %v1735_v6 = vld [vmem:[#allocation8 + $0x1e4] ss:$16 sps:$4 sm:$0xff]   ;;  %v1737_v7 = vld [vmem:[#allocation8 + $0x1e0] ss:$16 sps:$4 sm:$0xff]   ;;  %v466_v9 = vpack.c.bf16 %v465_v5, %v464_v4  ;;  %v1741_v11 = vld [vmem:[#allocation8 + $0x1e8] ss:$16 sps:$4 sm:$0xff]   ;;  %s2486_s5 = scalar_lea.hbm %s2577_s9, %s1583_s28 }
  0x9c   : > { %1599 = vmatprep.subr.bf16.mxu0 %v2143_v0  ;;  %v1738_v8 = vld [vmem:[#allocation8 + $0x1c4] ss:$16 sps:$4 sm:$0xff]   ;;  %762 = vmatprep.subr.bf16.mxu1 %v1735_v6  ;;  %v1740_v10 = vld [vmem:[#allocation8 + $0x1c0] ss:$16 sps:$4 sm:$0xff]   ;;  %v1743_v12 = vld [vmem:[#allocation8 + $0x1ec] ss:$16 sps:$4 sm:$0xff]  }
  0x9d   : > { %763 = vmatpush1.bf16.msra.mxu1 %v1737_v7  ;;  %v1744_v13 = vld [vmem:[#allocation8 + $0x1a4] ss:$16 sps:$4 sm:$0xff]   ;;  %v1749_v14 = vld [vmem:[#allocation8 + $0x1cc] ss:$16 sps:$4 sm:$0xff]   ;;  %v1746_v15 = vld [vmem:[#allocation8 + $0x1a0] ss:$16 sps:$4 sm:$0xff]  }
  0x9e   : > { %764 = vmatprep.subr.bf16.mxu1 %v1738_v8  ;;  %v1747_v16 = vld [vmem:[#allocation8 + $0x1c8] ss:$16 sps:$4 sm:$0xff]   ;;  %v1750_v17 = vld [vmem:[#allocation8 + $0x184] ss:$16 sps:$4 sm:$0xff]   ;;  %v1755_v18 = vld [vmem:[#allocation8 + $0x1ac] ss:$16 sps:$4 sm:$0xff]  }
  0x9f   : > { %1600 = vmatpush3.bf16.msra.mxu0 %v1734_v3  ;;  %v1752_v19 = vld [vmem:[#allocation8 + $0x180] ss:$16 sps:$4 sm:$0xff]   ;;  %v1753_v20 = vld [vmem:[#allocation8 + $0x1a8] ss:$16 sps:$4 sm:$0xff]   ;;  %v1756_v21 = vld [vmem:[#allocation8 + $0x164] ss:$16 sps:$4 sm:$0xff]  }
  0xa0   : > { %805 = vmatprep.subr.bf16.mxu0 %v1743_v12  ;;  %v1761_v22 = vld [vmem:[#allocation8 + $0x18c] ss:$16 sps:$4 sm:$0xff]   ;;  %v1758_v23 = vld [vmem:[#allocation8 + $0x160] ss:$16 sps:$4 sm:$0xff]   ;;  %v1759_v24 = vld [vmem:[#allocation8 + $0x188] ss:$16 sps:$4 sm:$0xff]  }
  0xa1   : > { %765 = vmatpush1.bf16.msra.mxu1 %v1740_v10  ;;  %v1762_v25 = vld [vmem:[#allocation8 + $0x144] ss:$16 sps:$4 sm:$0xff]   ;;  %v1767_v26 = vld [vmem:[#allocation8 + $0x16c] ss:$16 sps:$4 sm:$0xff]   ;;  %v1764_v27 = vld [vmem:[#allocation8 + $0x140] ss:$16 sps:$4 sm:$0xff]  }
  0xa2   : > { %1602 = vmatmul.mubr.msk.bf16.vlgmr.msra.gmra.mxu0 %vm490_vm1, %v466_v9  ;;  %766 = vmatprep.subr.bf16.mxu1 %v1744_v13  ;;  %v1765_v28 = vld [vmem:[#allocation8 + $0x168] ss:$16 sps:$4 sm:$0xff]   ;;  %v1768_v29 = vld [vmem:[#allocation8 + $0x124] ss:$16 sps:$4 sm:$0xff]   ;;  %v1773_v30 = vld [vmem:[#allocation8 + $0x14c] ss:$16 sps:$4 sm:$0xff]  }
  0xa3   : > { %806 = vmatpush1.bf16.msra.mxu0 %v1741_v11  ;;  %837 = vmatprep.mubr.bf16.mxu0 %v2145_v1  ;;  %v1770_v31 = vld [vmem:[#allocation8 + $0x120] ss:$16 sps:$4 sm:$0xff]   ;;  %v1771_v32 = vld [vmem:[#allocation8 + $0x148] ss:$16 sps:$4 sm:$0xff]   ;;  %v1774_v33 = vld [vmem:[#allocation8 + $0x104] ss:$16 sps:$4 sm:$0xff]  }
  0xa4   : > { %807 = vmatprep.subr.bf16.mxu0 %v1749_v14  ;;  %v1779_v34 = vld [vmem:[#allocation8 + $0x12c] ss:$16 sps:$4 sm:$0xff]   ;;  %v1776_v35 = vld [vmem:[#allocation8 + $0x100] ss:$16 sps:$4 sm:$0xff]   ;;  %v1777_v36 = vld [vmem:[#allocation8 + $0x128] ss:$16 sps:$4 sm:$0xff]  }
  0xa5   : > { %767 = vmatpush1.bf16.msra.mxu1 %v1746_v15  ;;  %v2430_v37 = vld [vmem:[%s395_s2] sm:$0xff]  ;;  %v2434_v38 = vld [vmem:[%s395_s2 + $0x8] sm:$0xff]  ;;  %s1308_s0 = sshll.u32 %s455_s26, 4  ;;  %s1279_s22 = scalar_lea.sflag [#allocation15], %s2393_s23  ;;  %s2488_s0 = int_to_ptr.vmem [resolvable:$true] %s1308_s0 }
  0xa6   : > { %768 = vmatprep.subr.bf16.mxu1 %v1750_v17  ;;  %v1782_v39 = vld [vmem:[#allocation8 + $0x10c] ss:$16 sps:$4 sm:$0xff]   ;;  %v1785_v40 = vld [vmem:[#allocation8 + $0xe4] ss:$16 sps:$4 sm:$0xff]   ;;  %v463_v41 = vpack.c.bf16 %v2434_v38, %v2430_v37  ;;  %v1780_v42 = vld [vmem:[#allocation8 + $0x108] ss:$16 sps:$4 sm:$0xff]  }
  0xa7   : > { %808 = vmatpush1.bf16.msra.mxu0 %v1747_v16  ;;  %v1783_v43 = vld [vmem:[#allocation8 + $0xe0] ss:$16 sps:$4 sm:$0xff]   ;;  %v1788_v44 = vld [vmem:[#allocation8 + $0xec] ss:$16 sps:$4 sm:$0xff]   ;;  %v1791_v45 = vld [vmem:[#allocation8 + $0xc4] ss:$16 sps:$4 sm:$0xff]  }
  0xa8   : > { %809 = vmatprep.subr.bf16.mxu0 %v1755_v18  ;;  %v1786_v46 = vld [vmem:[#allocation8 + $0xe8] ss:$16 sps:$4 sm:$0xff]   ;;  %v1789_v47 = vld [vmem:[#allocation8 + $0xc0] ss:$16 sps:$4 sm:$0xff]   ;;  %v1794_v48 = vld [vmem:[#allocation8 + $0xcc] ss:$16 sps:$4 sm:$0xff]  }
  0xa9   : > { %769 = vmatpush1.bf16.msra.mxu1 %v1752_v19  ;;  %v1797_v49 = vld [vmem:[#allocation8 + $0xa4] ss:$16 sps:$4 sm:$0xff]   ;;  %v1792_v50 = vld [vmem:[#allocation8 + $0xc8] ss:$16 sps:$4 sm:$0xff]   ;;  %v1795_v51 = vld [vmem:[#allocation8 + $0xa0] ss:$16 sps:$4 sm:$0xff]  }
  0xaa   : > { %770 = vmatprep.subr.bf16.mxu1 %v1756_v21  ;;  %v1800_v52 = vld [vmem:[#allocation8 + $0xac] ss:$16 sps:$4 sm:$0xff]   ;;  %v1803_v53 = vld [vmem:[#allocation8 + $0x84] ss:$16 sps:$4 sm:$0xff]   ;;  %v1798_v54 = vld [vmem:[#allocation8 + $0xa8] ss:$16 sps:$4 sm:$0xff]  }
  0xab   : > { %810 = vmatpush1.bf16.msra.mxu0 %v1753_v20  ;;  %v1801_v55 = vld [vmem:[#allocation8 + $0x80] ss:$16 sps:$4 sm:$0xff]   ;;  %v1806_v56 = vld [vmem:[#allocation8 + $0x8c] ss:$16 sps:$4 sm:$0xff]   ;;  %v1809_v57 = vld [vmem:[#allocation8 + $0x64] ss:$16 sps:$4 sm:$0xff]  }
  0xac   : > { %811 = vmatprep.subr.bf16.mxu0 %v1761_v22  ;;  %v1804_v58 = vld [vmem:[#allocation8 + $0x88] ss:$16 sps:$4 sm:$0xff]   ;;  %v1807_v59 = vld [vmem:[#allocation8 + $0x60] ss:$16 sps:$4 sm:$0xff]   ;;  %v1812_v60 = vld [vmem:[#allocation8 + $0x6c] ss:$16 sps:$4 sm:$0xff]  }
  0xad   : > { %771 = vmatpush1.bf16.msra.mxu1 %v1758_v23  ;;  %v1815_v61 = vld [vmem:[#allocation8 + $0x44] ss:$16 sps:$4 sm:$0xff]   ;;  %v1810_v62 = vld [vmem:[#allocation8 + $0x68] ss:$16 sps:$4 sm:$0xff]   ;;  %v1813_v63 = vld [vmem:[#allocation8 + $0x40] ss:$16 sps:$4 sm:$0xff]  }
  0xae   : > { %772 = vmatprep.subr.bf16.mxu1 %v1762_v25  ;;  %v1816_v2 = vld [vmem:[#allocation8 + $0x48] ss:$16 sps:$4 sm:$0xff]   ;;  %v1821_v3 = vld [vmem:[#allocation8 + $0x24] ss:$16 sps:$4 sm:$0xff]   ;;  %v1824_v4 = vld [vmem:[#allocation8 + $0x2c] ss:$16 sps:$4 sm:$0xff]  }
  0xaf   : > { %812 = vmatpush1.bf16.msra.mxu0 %v1759_v24  ;;  %v1819_v5 = vld [vmem:[#allocation8 + $0x20] ss:$16 sps:$4 sm:$0xff]   ;;  %v1822_v6 = vld [vmem:[#allocation8 + $0x28] ss:$16 sps:$4 sm:$0xff]   ;;  %v1827_v7 = vld [vmem:[#allocation8 + $0x4] ss:$16 sps:$4 sm:$0xff]  }
  0xb0   : > { %813 = vmatprep.subr.bf16.mxu0 %v1767_v26  ;;  %v1830_v8 = vld [vmem:[#allocation8 + $0xc] ss:$16 sps:$4 sm:$0xff]   ;;  %v1825_v9 = vld [vmem:[#allocation8] ss:$16 sps:$4 sm:$0xff]   ;;  %v1828_v10 = vld [vmem:[#allocation8 + $0x8] ss:$16 sps:$4 sm:$0xff]  }
  0xb1   : > { %773 = vmatpush1.bf16.msra.mxu1 %v1764_v27  ;;  %v1496_v11 = vld [vmem:[%s2571_s3] ss:$0 sm:$0xff]  ;;  %v1831_v21 = vld [vmem:[%s2574_s6 + $0x38] sm:$0xff]   ;;  %v1832_v22 = vld [vmem:[%s2574_s6 + $0x30] sm:$0xff]   ;;  %s2019_s14 = scalar_lea.vmem %s2488_s0, 256  ;;  %p2608_p5 = scmp.ne.s32.totalorder %s2597_s24, 0 }
  0xb2   : > { %774 = vmatprep.subr.bf16.mxu1 %v1768_v29  ;;  %v1833_v23 = vld [vmem:[%s2574_s6 + $0x28] sm:$0xff]   ;;  %v1834_v24 = vld [vmem:[%s2574_s6 + $0x20] sm:$0xff]   ;;  %v1835_v25 = vld [vmem:[%s2574_s6 + $0x18] sm:$0xff]   ;;  %p2020_p0 = scmp.ne.s32.totalorder %s2488_s0, %s2019_s14  ;;  %s2146_s27 = smov [#allocation14]  }
  0xb3   : > { %814 = vmatpush1.bf16.msra.mxu0 %v1765_v28  ;;  %v1836_v26 = vld [vmem:[%s2574_s6 + $0x10] sm:$0xff]   ;;  %v1837_v27 = vld [vmem:[%s2574_s6 + $0x8] sm:$0xff]   ;;  %v1838_v28 = vld [vmem:[%s2574_s6] sm:$0xff]   ;;  %s2023_s18 = sshll.u32 %s2146_s27, 4  ;;  %s2024_s18 = int_to_ptr.vmem [resolvable:$false] %s2023_s18 }
  0xb4   : > { %815 = vmatprep.subr.bf16.mxu0 %v1773_v30  ;;  %v1096_v30 = vlaneseq  ;;  %p2021_p1 = pnand %p2020_p0, %p2608_p5  ;;  %s2025_s20 = scalar_lea.vmem %s2024_s18, 512 }
  0xb5   : > { %775 = vmatpush1.bf16.msra.mxu1 %v1770_v31  ;;  %p2026_p13 = scmp.lt.s32.totalorder %s2488_s0, %s2024_s18  ;;  %p2027_p2 = scmp.lt.s32.totalorder %s2025_s20, %s2019_s14 }
  0xb6   : > { %776 = vmatprep.subr.bf16.mxu1 %v1774_v33  ;;  %p2022_p3 = pneg %p2021_p1 }
  0xb7   : > { %816 = vmatpush1.bf16.msra.mxu0 %v1771_v32  ;;  %v1097_v32 = vshrl.u32 %v1096_v30, 7  ;;  %p2028_p12 = por %p2027_p2, %p2026_p13 }
  0xb8   : > { %817 = vmatprep.subr.bf16.mxu0 %v1779_v34 }
  0xb9   : > { %777 = vmatpush1.bf16.msra.mxu1 %v1776_v35  ;;  %v1098_v34 = vsub.s32 0, %v1097_v32  ;;  %v1094_v35 = vld [vmem:[#allocation10] sm:$0xf]  ;;  %p2029_p10 = pnand %p2028_p12, %p2022_p3 }
  0xba   : > { %1008 = vmatprep.subr.bf16.mxu1 %v1785_v40 }
  0xbb   : > { %818 = vmatpush1.bf16.msra.mxu0 %v1777_v36 }
  0xbc   : > { %819 = vmatprep.subr.bf16.mxu0 %v1782_v39  ;;  %795 = vmatmul.mubr.bf16.vlgmr.msra.gmra.mxu1 %v463_v41  ;;  %v1099_v39 = vrot.slane %v1094_v35, %v1098_v34 }
  0xbd   : > { %1009 = vmatpush1.bf16.msra.mxu1 %v1783_v43  ;;  %1040 = vmatprep.mubr.bf16.mxu1 %v2145_v1 }
  0xbe   : > { %1010 = vmatprep.subr.bf16.mxu1 %v1791_v45 }
  0xbf   : > { %820 = vmatpush1.bf16.msra.mxu0 %v1780_v42 }
  0xc0   : > { %1051 = vmatprep.subr.bf16.mxu0 %v1788_v44  ;;  %v1102_v44 = vsub.s32 1, %v1097_v32 }
  0xc1   : > { %1011 = vmatpush1.bf16.msra.mxu1 %v1789_v47 }
  0xc2   : > { %838 = vmatmul.mubr.bf16.vlgmr.msra.gmra.mxu0 %v463_v41  ;;  %1012 = vmatprep.subr.bf16.mxu1 %v1797_v49 }
  0xc3   : > { %1052 = vmatpush1.bf16.msra.mxu0 %v1786_v46  ;;  %1083 = vmatprep.mubr.bf16.mxu0 %v2145_v1  ;;  %v1818_v1 = vld [vmem:[#allocation8 + $0x4c] ss:$16 sps:$4 sm:$0xff]  }
  0xc4   : > { %1053 = vmatprep.subr.bf16.mxu0 %v1794_v48 }
  0xc5   : > { %1013 = vmatpush1.bf16.msra.mxu1 %v1795_v51  ;;  %v1103_v51 = vrot.slane %v1094_v35, %v1102_v44 }
  0xc6   : > { %1014 = vmatprep.subr.bf16.mxu1 %v1803_v53 }
  0xc7   : > { %1054 = vmatpush1.bf16.msra.mxu0 %v1792_v50 }
  0xc8   : > { %1055 = vmatprep.subr.bf16.mxu0 %v1800_v52 }
  0xc9   : > { %1015 = vmatpush1.bf16.msra.mxu1 %v1801_v55 }
  0xca   : > { %1016 = vmatprep.subr.bf16.mxu1 %v1809_v57 }
  0xcb   : > { %1056 = vmatpush1.bf16.msra.mxu0 %v1798_v54 }
  0xcc   : > { %1057 = vmatprep.subr.bf16.mxu0 %v1806_v56 }
  0xcd   : > { %1017 = vmatpush1.bf16.msra.mxu1 %v1807_v59 }
  0xce   : > { %1018 = vmatprep.subr.bf16.mxu1 %v1815_v61 }
  0xcf   : > { %1058 = vmatpush1.bf16.msra.mxu0 %v1804_v58 }
  0xd0   : > { %1059 = vmatprep.subr.bf16.mxu0 %v1812_v60 }
  0xd1   : > { %1019 = vmatpush1.bf16.msra.mxu1 %v1813_v63 }
  0xd2   : > { %1020 = vmatprep.subr.bf16.mxu1 %v1821_v3 }
  0xd3   : > { %1060 = vmatpush1.bf16.msra.mxu0 %v1810_v62 }
  0xd4   : > { %1061 = vmatprep.subr.bf16.mxu0 %v1818_v1 }
  0xd5   : > { %1021 = vmatpush1.bf16.msra.mxu1 %v1819_v5 }
  0xd6   : > { %1022 = vmatprep.subr.bf16.mxu1 %v1827_v7 }
  0xd7   : > { %1062 = vmatpush1.bf16.msra.mxu0 %v1816_v2 }
  0xd8   : > { %1063 = vmatprep.subr.bf16.mxu0 %v1824_v4 }
  0xd9   : > { %1023 = vmatpush1.bf16.msra.mxu1 %v1825_v9 }
  0xda   : > { %1605 = vmatprep.subr.bf16.mxu1 %v2143_v0 }
  0xdb   : > { %1064 = vmatpush1.bf16.msra.mxu0 %v1822_v6 }
  0xdc   : > { %1065 = vmatprep.subr.bf16.mxu0 %v1830_v8  ;;  %v1110_v8 = vsub.s32 3, %v1097_v32 }
  0xdf   : > { %1066 = vmatpush1.bf16.msra.mxu0 %v1828_v10  ;;  %v1106_v10 = vsub.s32 2, %v1097_v32 }
 0x162   : > { %v528_v12 = vpop.f32.mrf.mxu0 }
 0x163   : > { %v529_v14 = vadd.f32 %v1496_v11, %v528_v12  ;;  %v1111_v12 = vrot.slane %v1094_v35, %v1110_v8 }
 0x164   : > { %v1603_v13 = vpop.f32.mrf.mxu0 }
 0x165   : > { %v535_v18 = vmax.f32 %v529_v14, 0.0 }
 0x166   : > { %v531_v15 = vpop.f32.mrf.mxu0 }
 0x167   : > { %v532_v16 = vadd.f32 %v1496_v11, %v531_v15  ;;  %v1107_v15 = vrot.slane %v1094_v35, %v1106_v10 }
 0x168   : > { %v1604_v17 = vpop.f32.mrf.mxu0 }
 0x169   : > { %v536_v19 = vmax.f32 %v532_v16, 0.0 }
 0x16b   : > { %v537_v20 = vpack.c.bf16 %v536_v19, %v535_v18 }
 0x16d   : > { %1041 = vmatmul.mubr.bf16.vlgmr.msra.gmra.mxu1 %v537_v20  ;;  %1084 = vmatmul.mubr.bf16.vlgmr.msra.gmra.mxu0 %v537_v20 }
 0x16e   : > { %1621 = vmatprep.mubr.msk.bf16.mxu1 %vm2144_vm0, %v2143_v0  ;;  %1606 = vmatpush3.bf16.msra.mxu1 %v1831_v21 }
 0x16f   : > { %1607 = vmatprep.subr.bf16.mxu1 %v2143_v0 }
 0x172   : > { %1608 = vmatpush3.bf16.msra.mxu1 %v1832_v22 }
 0x173   : > { %1609 = vmatprep.subr.bf16.mxu1 %v2143_v0 }
 0x176   : > { %1610 = vmatpush3.bf16.msra.mxu1 %v1833_v23 }
 0x177   : > { %1611 = vmatprep.subr.bf16.mxu1 %v2143_v0 }
 0x17a   : > { %1612 = vmatpush3.bf16.msra.mxu1 %v1834_v24 }
 0x17b   : > { %1613 = vmatprep.subr.bf16.mxu1 %v2143_v0 }
 0x17c   : > { %v796_v29 = vpop.f32.mrf.mxu1 }
 0x17e   : > { %1614 = vmatpush3.bf16.msra.mxu1 %v1835_v25  ;;  %v798_v31 = vpop.f32.mrf.mxu1 }
 0x17f   : > { %1615 = vmatprep.subr.bf16.mxu1 %v2143_v0 }
 0x180   : > { %v800_v33 = vpop.f32.mrf.mxu1 }
 0x182   : > { %1616 = vmatpush3.bf16.msra.mxu1 %v1836_v26  ;;  %v802_v36 = vpop.f32.mrf.mxu1  ;;  %v839_v48 = vpop.f32.mrf.mxu0 }
 0x183   : > { %1617 = vmatprep.subr.bf16.mxu1 %v2143_v0 }
 0x184   : > { %v841_v54 = vpop.f32.mrf.mxu0 }
 0x186   : > { %1618 = vmatpush3.bf16.msra.mxu1 %v1837_v27  ;;  %v843_v58 = vpop.f32.mrf.mxu0 }
 0x187   : > { %1619 = vmatprep.subr.bf16.mxu1 %v2143_v0 }
 0x188   : > { %v845_v61 = vpop.f32.mrf.mxu0 }
 0x18a   : > { %1620 = vmatpush3.bf16.msra.mxu1 %v1838_v28 }
 0x22d   : > { %v1042_v40 = vpop.f32.mrf.mxu1  ;;  %v1085_v2 = vpop.f32.mrf.mxu0 }
 0x22e   : > { %v1043_v41 = vadd.f32 %v1042_v40, %v796_v29  ;;  %v1086_v14 = vadd.f32 %v1085_v2, %v839_v48 }
 0x22f   : > { %v1044_v42 = vpop.f32.mrf.mxu1  ;;  %v1087_v6 = vpop.f32.mrf.mxu0 }
 0x230   : > { %v1116_v43 = vadd.f32 %v1099_v39, %v1043_v41  ;;  %v1045_v50 = vadd.f32 %v1044_v42, %v798_v31  ;;  %v1088_v11 = vadd.f32 %v1087_v6, %v841_v54  ;;  %v1118_v20 = vadd.f32 %v1107_v15, %v1086_v14 }
 0x231   : > { %v1046_v45 = vpop.f32.mrf.mxu1  ;;  %v1089_v9 = vpop.f32.mrf.mxu0 }
 0x232   : > { %v1124_v46 = vsub.f32 0.0, %v1116_v43  ;;  %v1047_v47 = vadd.f32 %v1046_v45, %v800_v33  ;;  %v1117_v56 = vadd.f32 %v1103_v51, %v1045_v50  ;;  %v1119_v17 = vadd.f32 %v1111_v12, %v1088_v11 }
 0x233   : > { %v1048_v53 = vpop.f32.mrf.mxu1  ;;  %v1091_v13 = vpop.f32.mrf.mxu0  ;;  %v1090_v22 = vadd.f32 %v1089_v9, %v843_v58 }
 0x234   : > { %v1126_v0 = vmul.f32 1.442695, %v1124_v46  ;;  %v1120_v49 = vadd.f32 %v1099_v39, %v1047_v47  ;;  %v1049_v57 = vadd.f32 %v1048_v53, %v802_v36  ;;  %v1134_v59 = vsub.f32 0.0, %v1117_v56 }
 0x235   : > { %v1092_v18 = vadd.f32 %v1091_v13, %v845_v61  ;;  %v1122_v28 = vadd.f32 %v1107_v15, %v1090_v22 }
 0x236   : > { %1839 = vpow2.f32 %v1126_v0  ;;  %v1125_v52 = vsub.f32 0.0, %v1120_v49  ;;  %v1121_v60 = vadd.f32 %v1103_v51, %v1049_v57  ;;  %v1136_v62 = vmul.f32 1.442695, %v1134_v59 }
 0x237   : > { %v1123_v26 = vadd.f32 %v1111_v12, %v1092_v18 }
 0x238   : > { %v1128_v55 = vmul.f32 1.442695, %v1125_v52  ;;  %v1135_v63 = vsub.f32 0.0, %v1121_v60 }
 0x23a   : > { %1841 = vpow2.f32 %v1128_v55  ;;  %v1138_v4 = vmul.f32 1.442695, %v1135_v63 }
 0x23b   : > { %1843 = vpow2.f32 %v1136_v62 }
 0x243   : > { %v1840_v1 = vpop.eup %1839 }
 0x244   : > { %v1130_v3 = vadd.f32 1.0, %v1840_v1 }
 0x246   : > { %1845 = vrcp.f32 %v1130_v3 }
 0x247   : > { %v1842_v5 = vpop.eup %1841  ;;  %1847 = vpow2.f32 %v1138_v4 }
 0x248   : > { %v1131_v7 = vadd.f32 1.0, %v1842_v5  ;;  %v1844_v16 = vpop.eup %1843 }
 0x249   : > { %v1140_v24 = vadd.f32 1.0, %v1844_v16 }
 0x24a   : > { %1849 = vrcp.f32 %v1131_v7 }
 0x253   : > { %v1846_v19 = vpop.eup %1845 }
 0x254   : > { %v1144_v21 = vmul.f32 %v1846_v19, %v1119_v17  ;;  %v1848_v23 = vpop.eup %1847 }
 0x255   : > { %v1141_v30 = vadd.f32 1.0, %v1848_v23 }
 0x256   : > { %v1146_v25 = vadd.f32 %v1144_v21, %v1118_v20 }
 0x257   : > { %v1850_v27 = vpop.eup %1849 }
 0x258   : > { %1851 = vtanh.f32 %v1146_v25  ;;  %v1145_v29 = vmul.f32 %v1850_v27, %v1123_v26 }
 0x259   : > { %1853 = vrcp.f32 %v1140_v24 }
 0x25a   : > { %v1147_v31 = vadd.f32 %v1145_v29, %v1122_v28 }
 0x25c   : > { %1855 = vtanh.f32 %v1147_v31 }
 0x25d   : > { %1857 = vrcp.f32 %v1141_v30 }
 0x265   : > { %v1852_v32 = vpop.eup %1851 }
 0x266   : > { %v1150_v33 = vsub.f32 %v2430_v37, %v1852_v32  ;;  %v1854_v34 = vpop.eup %1853 }
 0x268   : > { %v1152_v35 = vmul.f32 %v1854_v34, %v1150_v33 }
 0x269   : > { %v1856_v36 = vpop.eup %1855 }
 0x26a   : > { %v1151_v39 = vsub.f32 %v2434_v38, %v1856_v36  ;;  %v1154_v40 = vadd.f32 %v1852_v32, %v1152_v35  ;;  %v1858_v41 = vpop.eup %1857 }
 0x26c   : > { %v1153_v42 = vmul.f32 %v1858_v41, %v1151_v39  ;;  %1271 = vst [vmem:[%s455_s26] sm:$0xff] %v1154_v40 }
 0x26e   : > { %v1155_v43 = vadd.f32 %v1856_v36, %v1153_v42 }
 0x270   : > { %v1156_v44 = vpack.c.bf16 %v1155_v43, %v1154_v40  ;;  %1272 = vst [vmem:[%s455_s26 + $0x8] sm:$0xff] %v1155_v43 }
 0x272   : > { %1622 = vmatmul.mubr.bf16.vlgmr.msra.gmra.mxu1 %v1156_v44 }
 0x273   : > { %2032 = shalt.err (!%p2029_p10)
}
 0x274   : > { %s2033_s7 = scalar_lea.hbm %s2486_s5, 256  ;;  %s2037_s15 = scalar_lea.hbm %s2577_s9, 512 }
 0x275   : > { %p2034_p8 = scmp.ne.s32.totalorder %s2486_s5, %s2033_s7  ;;  %p2038_p6 = scmp.lt.s32.totalorder %s2486_s5, %s2577_s9 }
 0x276   : > { %p2039_p7 = scmp.lt.s32.totalorder %s2037_s15, %s2033_s7 }
 0x277   : > { %p2035_p11 = pnand %p2034_p8, %p2608_p5 }
 0x278   : > { %p2040_p9 = por %p2039_p7, %p2038_p6 }
 0x279   : > { %p2036_p4 = pneg %p2035_p11 }
 0x27b   : > { %p2041_p0 = pnand %p2040_p9, %p2036_p4 }
 0x27d   : > { %2044 = shalt.err (!%p2041_p0)
}
 0x27e   : > { %s2147_s19 = smov 128   ;;  %s2148_s25 = smov 8   ;;  %v1564_v37 = vld [vmem:[#allocation11] ss:$0 sm:$0xff] }
 0x27f   : > { %1646 = dma.vmem_to_hbm [thread:$0]  (%p2608_p5), %s2488_s0, 256, %s2486_s5, %s1279_s22, %s2147_s19, %s2147_s19, %s2148_s25  }
 0x280   : > { %s448_s14 = scalar_lea.vmem [#allocation13], %s2396_s29  ;;  %s2524_s5 = scalar_lea.hbm %s2576_s8, %s1583_s28 }
 0x281   : > { %s1292_s27 = sshll.u32 %s448_s14, 4  ;;  %s1274_s0 = scalar_lea.sflag [#allocation4], %s2393_s23  ;;  %s2517_s27 = int_to_ptr.vmem [resolvable:$true] %s1292_s27 }
 0x282   : > { %s2045_s29 = scalar_lea.vmem %s2517_s27, 256  ;;  %s2149_s22 = smov [#allocation13]  }
 0x283   : > { %p2046_p1 = scmp.ne.s32.totalorder %s2517_s27, %s2045_s29  ;;  %s2049_s7 = sshll.u32 %s2149_s22, 4  ;;  %s2050_s7 = int_to_ptr.vmem [resolvable:$false] %s2049_s7 }
 0x284   : > { %s2051_s17 = scalar_lea.vmem %s2050_s7, 512  ;;  %p2052_p2 = scmp.lt.s32.totalorder %s2517_s27, %s2050_s7 }
 0x285   : > { %p2047_p3 = pnand %p2046_p1, %p2608_p5  ;;  %p2053_p12 = scmp.lt.s32.totalorder %s2051_s17, %s2045_s29 }
 0x287   : > { %p2048_p13 = pneg %p2047_p3  ;;  %p2054_p10 = por %p2053_p12, %p2052_p2 }
 0x289   : > { %p2055_p8 = pnand %p2054_p10, %p2048_p13 }
 0x332   : > { %v1262_v38 = vpop.f32.mrf.mxu1 }
 0x333   : > { %v1263_v45 = vadd.f32 %v1564_v37, %v1262_v38 }
 0x334   : > { %v1623_v46 = vpop.f32.mrf.mxu1 }
 0x335   : > { %1269 = vst [vmem:[%s448_s14] sm:$0xff] %v1263_v45 }
 0x336   : > { %v1265_v47 = vpop.f32.mrf.mxu1 }
 0x337   : > { %v1266_v48 = vadd.f32 %v1564_v37, %v1265_v47 }
 0x338   : > { %v1624_v0 = vpop.f32.mrf.mxu1 }
 0x339   : > { %1270 = vst [vmem:[%s448_s14 + $0x8] sm:$0xff] %v1266_v48 }
 0x33a   : > { %2058 = shalt.err (!%p2055_p8)
}
 0x33b   : > { %s2059_s13 = scalar_lea.hbm %s2524_s5, 256  ;;  %s2063_s2 = scalar_lea.hbm %s2576_s8, 512 }
 0x33c   : > { %p2060_p11 = scmp.ne.s32.totalorder %s2524_s5, %s2059_s13  ;;  %p2064_p7 = scmp.lt.s32.totalorder %s2524_s5, %s2576_s8 }
 0x33d   : > { %p2065_p9 = scmp.lt.s32.totalorder %s2063_s2, %s2059_s13 }
 0x33e   : > { %p2061_p4 = pnand %p2060_p11, %p2608_p5 }
 0x33f   : > { %p2066_p0 = por %p2065_p9, %p2064_p7 }
 0x340   : > { %p2062_p6 = pneg %p2061_p4 }
 0x342   : > { %p2067_p1 = pnand %p2066_p0, %p2062_p6 }
 0x344   : > { %2070 = shalt.err (!%p2067_p1)
}
 0x345   : > { %1645 = dma.vmem_to_hbm [thread:$0]  (%p2608_p5), %s2517_s27, 256, %s2524_s5, %s1274_s0, %s2147_s19, %s2147_s19, %s2148_s25  }
 0x346 PF: > { %s1323_s26 = sand.u32 1, %s2117_s30   ;;  %p2609_p3 = scmp.ne.s32.totalorder %s2588_s16, 0 }
 0x347   : > { %p2610_p13 = scmp.ge.s32.totalorder %s2129_s12, 2  ;;  %s1324_s14 = scalar_lea.sflag [#allocation4], %s1323_s26 }
 0x349   : > { %p1670_p2 = pnand %p2610_p13, %p2609_p3 }
 0x34b   : > { %p1671_p12 = pneg %p1670_p2 }
 0x34d   : > { %2108 = dma.done.wait (%p1671_p12), %s1324_s14, 256  }
 0x34e   : > { %2110 = vsyncadd (%p1671_p12), %s1324_s14, 4294967040  ;;  %s1333_s18 = scalar_lea.sflag [#allocation15], %s1323_s26 }
 0x34f   : > { %2112 = dma.done.wait (%p1671_p12), %s1333_s18, 256  }
 0x350   : > { %2114 = vsyncadd (%p1671_p12), %s1333_s18, 4294967040  ;;  %s2611_s24 = sld [smem:[#allocation23_spill]]  ;;  %p31_p5 = scmp.ge.s32.totalorder %s2288_s21, 4  }
 0x351   : > { %s2612_s30 = smov %s2121_s10  ;;  %s2613_s10 = smov %s2125_s11 }
 0x352   : > { %s2615_s12 = smov %s2288_s21  ;;  %33 = sbr.rel (!%p31_p5) target bundleno = 17 (0x11), region = 143 }
 0x356   : > { %s2614_s11 = smov %s2611_s24 }
 0x357   :  { %1338 = vsyncpa [#allocation3], 1 }
 0x358   :  { %1340 = vsyncpa [#allocation3 + $0x1], 1 }
 0x359   :  { %1341 = vsyncpa [#allocation6], 1 }
 0x35a   :  { %1343 = vsyncpa [#allocation6 + $0x1], 1 }
 0x35b   :  { %1344 = vsyncpa [#allocation9], 1 }
 0x35c   :  { %1345 = vsyncpa [#allocation12], 1 }
 0x35d   :  { %1346 = vsyncpa [#allocation4], 1 }
 0x35e   :  { %1348 = vsyncpa [#allocation4 + $0x1], 1 }
 0x35f   :  { %1349 = vsyncpa [#allocation15], 1 }
 0x360   :  { %1351 = vsyncpa [#allocation15 + $0x1], 1 }

</bundles_post_ra>
